<compile_context>
chip_gen: v7x
topology: tpu7x:2x2x1
jax: 0.10.0
libtpu: 0.0.40
codegen_flags: <defaults>
</compile_context>

<pallas_src>
import functools

import jax
import jax.numpy as jnp
import numpy as np
from jax.experimental import pallas as pl
from jax.experimental.pallas import tpu as pltpu


# ----------------------------- kernels --------------------------------------


def _dyn_conv_relu_2d(w_ref, x_ref, o_ref, *, compute_dtype):
    """Bt == 1 (batch squeezed): (C_out, C_in) @ (C_in, T) -> ReLU -> (C_out, T)."""
    x = x_ref[...].astype(compute_dtype)
    out = jnp.dot(w_ref[...], x, preferred_element_type=jnp.float32)
    o_ref[...] = jnp.maximum(out, 0.0).astype(o_ref.dtype)


def _dyn_conv_relu_batched(w_ref, x_ref, o_ref, *, compute_dtype):
    """Bt > 1: (Bt, C_out, C_in) @ (Bt, C_in, T) -> ReLU -> (Bt, C_out, T)."""
    x = x_ref[...].astype(compute_dtype)
    out = jnp.einsum("bok,bkn->bon", w_ref[...], x,
                     preferred_element_type=jnp.float32)
    o_ref[...] = jnp.maximum(out, 0.0).astype(o_ref.dtype)


# ----------------------------- wrapper ---------------------------------------


def _pick_bt(B, n_hw, per_batch_bytes):
    """Batch-block tiny spatial levels, but never collapse the grid below
    min(4, total_steps) steps (keep both TCs busy on v7x + pipeline overlap)."""
    if n_hw != 1:
        return 1
    cap = max(1, (1 << 20) // max(1, per_batch_bytes))   # ~1 MiB activation/step
    min_steps = min(4, B * n_hw)
    for cand in range(min(B, cap), 0, -1):
        if B % cand == 0 and (B // cand) * n_hw >= min_steps:
            return cand
    return 1


def task_decomposition(feat, params, *, tile_hw=None, compute_dtype=None):
    """TaskDecomposition forward.

    feat:   (B, C_in, H, W) NCHW, C_in = feat_channels * stacked_convs.
    params: (la1_w, la1_b, la2_w, la2_b, red_w) in PyTorch 1x1-conv (out, in)
            layout (spatial 1x1 dims squeezed).
    """
    la1_w, la1_b, la2_w, la2_b, red_w = params
    B, C_in, H, W = feat.shape
    HW = H * W
    C_out = red_w.shape[0]                    # feat_channels
    S = la2_w.shape[0]                        # stacked_convs
    assert C_in == C_out * S

    out_dtype = feat.dtype
    if compute_dtype is None:
        compute_dtype = feat.dtype
    compute_dtype = jnp.dtype(compute_dtype)

    # ---- Attention / dynamic-weight path (tiny; plain JAX). ----
    # F.adaptive_avg_pool2d(feat, (1,1)) == mean over spatial positions.
    avg = jnp.mean(feat.astype(jnp.float32), axis=(2, 3))               # (B, C_in)
    z1 = jax.nn.relu(avg @ la1_w.astype(jnp.float32).T + la1_b)         # (B, hidden)
    att = jax.nn.sigmoid(z1 @ la2_w.astype(jnp.float32).T + la2_b)      # (B, S)
    # conv_weight[b, o, s*C_out + i] = att[b, s] * red_w[o, s*C_out + i]
    w = att[:, None, :, None] * red_w.reshape(1, C_out, S, C_out).astype(jnp.float32)
    w = w.reshape(B, C_out, C_in).astype(compute_dtype)                 # tiny cast
    # NOTE: reduction_conv.conv owns a bias (norm_cfg is None) but the PyTorch
    # forward never applies it, so it is intentionally omitted here too.

    # ---- Hot path: batched matmul + ReLU in Pallas (no cast, no pad). ----
    x = feat.reshape(B, C_in, HW)             # layout-preserving reshape only
    feat_isz = jnp.dtype(feat.dtype).itemsize
    out_isz = jnp.dtype(out_dtype).itemsize
    w_isz = compute_dtype.itemsize

    lane = 128
    if tile_hw is None:
        tile_hw = 16384 if feat_isz <= 2 else 8192
    T_target = max(lane, (int(tile_hw) // lane) * lane)
    if HW <= T_target:
        T = HW                                 # single full-extent block (legal)
    else:
        T = T_target                           # 128-multiple; edge block masked
    n_hw = pl.cdiv(HW, T)

    Bt = _pick_bt(B, n_hw, C_in * HW * feat_isz)
    grid = (B // Bt, n_hw)

    if Bt == 1:
        kernel = functools.partial(_dyn_conv_relu_2d, compute_dtype=compute_dtype)
        in_specs = [
            pl.BlockSpec((None, C_out, C_in), lambda b, t: (b, 0, 0)),   # dyn weight
            pl.BlockSpec((None, C_in, T), lambda b, t: (b, 0, t)),       # feat tile
        ]
        out_spec = pl.BlockSpec((None, C_out, T), lambda b, t: (b, 0, t))
    else:
        kernel = functools.partial(_dyn_conv_relu_batched, compute_dtype=compute_dtype)
        in_specs = [
            pl.BlockSpec((Bt, C_out, C_in), lambda b, t: (b, 0, 0)),
            pl.BlockSpec((Bt, C_in, T), lambda b, t: (b, 0, t)),
        ]
        out_spec = pl.BlockSpec((Bt, C_out, T), lambda b, t: (b, 0, t))

    # Double-buffered per-step working set (x + out + weight), with headroom.
    step_bytes = Bt * (C_in * T * feat_isz + C_out * T * out_isz
                       + C_out * C_in * w_isz)
    vmem_limit = int(min(48 * 2**20, max(32 * 2**20, 4 * step_bytes)))

    cost = pl.CostEstimate(
        flops=2 * B * C_out * C_in * HW,
        transcendentals=0,
        bytes_accessed=B * (C_in * HW * feat_isz
                            + C_out * HW * out_isz
                            + C_out * C_in * w_isz),
    )

    out = pl.pallas_call(
        kernel,
        out_shape=jax.ShapeDtypeStruct((B, C_out, HW), out_dtype),
        grid_spec=pltpu.PrefetchScalarGridSpec(
            num_scalar_prefetch=0,
            grid=grid,
            in_specs=in_specs,
            out_specs=out_spec,
        ),
        compiler_params=pltpu.CompilerParams(
            dimension_semantics=("parallel", "parallel"),
            vmem_limit_bytes=vmem_limit,
        ),
        cost_estimate=cost,
    )(w, x)

    return out.reshape(B, C_out, H, W)


# ----------------------------- reference -------------------------------------


def reference(feat, params):
    """Pure-JAX reference mirroring the PyTorch forward exactly (f32)."""
    la1_w, la1_b, la2_w, la2_b, red_w = params
    B, C_in, H, W = feat.shape
    C_out = red_w.shape[0]
    S = la2_w.shape[0]
    avg = feat.astype(jnp.float32).mean(axis=(2, 3))        # (B, C_in)
    z1 = jax.nn.relu(avg @ la1_w.T + la1_b)                 # (B, hidden)
    att = jax.nn.sigmoid(z1 @ la2_w.T + la2_b)              # (B, S)
    conv_w = att[:, None, :, None] * red_w.reshape(1, C_out, S, C_out)
    conv_w = conv_w.reshape(B, C_out, C_in)
    out = jnp.einsum("boc,bcp->bop", conv_w,
                     feat.reshape(B, C_in, H * W).astype(jnp.float32))
    return jax.nn.relu(out).reshape(B, C_out, H, W)


if __name__ == "__main__":
    feat_channels = 32
    stacked_convs = 4
    la_down_rate = 8
    C_in = feat_channels * stacked_convs          # 128
    hidden = C_in // la_down_rate                 # 16

    key = jax.random.PRNGKey(0)
    k_f1, k_f2, k_f3, k_f4, k1, k2, k3 = jax.random.split(key, 7)

    # Deterministic synthetic parameters (normal_init std=0.001 / 0.01, zero bias).
    la1_w = 0.001 * jax.random.normal(k1, (hidden, C_in), jnp.float32)
    la1_b = jnp.zeros((hidden,), jnp.float32)
    la2_w = 0.001 * jax.random.normal(k2, (stacked_convs, hidden), jnp.float32)
    la2_b = jnp.zeros((stacked_convs,), jnp.float32)
    red_w = 0.01 * jax.random.normal(k3, (feat_channels, C_in), jnp.float32)
    params = (la1_w, la1_b, la2_w, la2_b, red_w)

    # Case 1: 16x16 spatial (HW=256), f32, single tile, Bt=1 squeezed 2-D path.
    feat = jax.random.normal(k_f1, (2, C_in, 16, 16), jnp.float32)
    out = jax.block_until_ready(task_decomposition(feat, params))
    np.testing.assert_allclose(np.asarray(out), np.asarray(reference(feat, params)),
                               rtol=1e-4, atol=1e-5)

    # Case 2: odd stride 13x13 (HW=169, not a 128-multiple): full-extent block,
    # no padding and no output slicing anywhere.
    feat13 = jax.random.normal(k_f2, (2, C_in, 13, 13), jnp.float32)
    out13 = jax.block_until_ready(task_decomposition(feat13, params))
    np.testing.assert_allclose(np.asarray(out13), np.asarray(reference(feat13, params)),
                               rtol=1e-4, atol=1e-5)

    # Case 3: bf16 matmul inputs (cast inside the kernel, f32 accumulation).
    out_bf16 = jax.block_until_ready(
        task_decomposition(feat, params, compute_dtype=jnp.bfloat16))
    np.testing.assert_allclose(np.asarray(out_bf16), np.asarray(reference(feat, params)),
                               rtol=5e-2, atol=5e-3)

    # Case 4: larger batch, tiny spatial (8x8) -> batched (Bt>1) kernel path,
    # grid kept at >= 4 steps.
    feat8 = jax.random.normal(k_f3, (8, C_in, 8, 8), jnp.float32)
    out8 = jax.block_until_ready(task_decomposition(feat8, params))
    np.testing.assert_allclose(np.asarray(out8), np.asarray(reference(feat8, params)),
                               rtol=1e-4, atol=1e-5)

    # Case 5: multi-tile spatial axis with a masked partial edge block
    # (HW=2400, T=1024 -> 3 tiles, last tile has 352 live columns).
    feat_big = jax.random.normal(k_f4, (2, C_in, 40, 60), jnp.float32)
    out_big = jax.block_until_ready(
        task_decomposition(feat_big, params, tile_hw=1024))
    np.testing.assert_allclose(np.asarray(out_big),
                               np.asarray(reference(feat_big, params)),
                               rtol=1e-4, atol=1e-5)

    print("KERNEL_OK")
</pallas_src>

<mosaic_0001>
module attributes {stable_mosaic.version = 11 : i64} {
  func.func @_dyn_conv_relu_2d(%arg0: i32, %arg1: i32, %arg2: memref<1x32x128xf32, #tpu.memory_space<vmem>>, %arg3: memref<1x128x256xf32, #tpu.memory_space<vmem>>, %arg4: memref<1x32x256xf32, #tpu.memory_space<vmem>>) attributes {dimension_semantics = [#tpu.dimension_semantics<parallel>, #tpu.dimension_semantics<parallel>], iteration_bounds = array<i64: 2, 1>, scalar_prefetch = 0 : i64, scratch_operands = 0 : i64, tpu.core_type = #tpu.core_type<tc>, window_params = [{transform_indices = @transform_0, window_bounds = array<i64: 1, 32, 128>}, {transform_indices = @transform_1, window_bounds = array<i64: 1, 128, 256>}, {transform_indices = @transform_2, window_bounds = array<i64: 1, 32, 256>}]} {
    %c0 = arith.constant 0 : index
    %c0_0 = arith.constant 0 : index
    %c0_1 = arith.constant 0 : index
    %0 = vector.load %arg3[%c0, %c0_0, %c0_1] : memref<1x128x256xf32, #tpu.memory_space<vmem>>, vector<1x128x256xf32>
    %1 = vector.shape_cast %0 : vector<1x128x256xf32> to vector<128x256xf32>
    %c0_2 = arith.constant 0 : index
    %c0_3 = arith.constant 0 : index
    %c0_4 = arith.constant 0 : index
    %2 = vector.load %arg2[%c0_2, %c0_3, %c0_4] : memref<1x32x128xf32, #tpu.memory_space<vmem>>, vector<1x32x128xf32>
    %3 = vector.shape_cast %2 : vector<1x32x128xf32> to vector<32x128xf32>
    %cst = arith.constant dense<0.000000e+00> : vector<32x256xf32>
    %4 = tpu.matmul %3, %1, %cst {dimension_numbers = #tpu.dot_dimension_numbers<[1], [0], [0], [1], [0, 0, 1, 1], [], []>} : vector<32x128xf32>, vector<128x256xf32>, vector<32x256xf32> -> vector<32x256xf32>
    %cst_5 = arith.constant 0.000000e+00 : f32
    %5 = vector.broadcast %cst_5 : f32 to vector<32x256xf32>
    %6 = arith.maximumf %4, %5 : vector<32x256xf32>
    %c0_6 = arith.constant 0 : index
    %c0_7 = arith.constant 0 : index
    %c0_8 = arith.constant 0 : index
    %7 = vector.load %arg4[%c0_6, %c0_7, %c0_8] : memref<1x32x256xf32, #tpu.memory_space<vmem>>, vector<1x32x256xf32>
    %8 = vector.shape_cast %7 : vector<1x32x256xf32> to vector<32x256xf32>
    %9 = vector.shape_cast %6 : vector<32x256xf32> to vector<1x32x256xf32>
    tpu.vector_store %arg4[%c0_6, %c0_7, %c0_8], %9 {strides = array<i32>} : memref<1x32x256xf32, #tpu.memory_space<vmem>>, vector<1x32x256xf32>,
    return
  }
  func.func @transform_0(%arg0: i32, %arg1: i32) -> (i32, i32, i32) {
    %c0_i32 = arith.constant 0 : i32
    %c0_i32_0 = arith.constant 0 : i32
    %c0_i32_1 = arith.constant 0 : i32
    return %arg0, %c0_i32, %c0_i32_0 : i32, i32, i32
  }
  func.func @transform_1(%arg0: i32, %arg1: i32) -> (i32, i32, i32) {
    %c0_i32 = arith.constant 0 : i32
    %c0_i32_0 = arith.constant 0 : i32
    return %arg0, %c0_i32, %arg1 : i32, i32, i32
  }
  func.func @transform_2(%arg0: i32, %arg1: i32) -> (i32, i32, i32) {
    %c0_i32 = arith.constant 0 : i32
    %c0_i32_0 = arith.constant 0 : i32
    return %arg0, %c0_i32, %arg1 : i32, i32, i32
  }
}

</mosaic_0001>

<bundles_post_ra>
// kernel: tpu_custom_call.1
= control target key start
LH: loop header
LB: loop body
LE: loop exit
PB: predicated region body
PF: predicated region fallthrough
CT: control target
= control target key end

     0   :  { %7 = vsyncpa [#allocation3], 0  ;;  %s1076_s0 = inlined_call_operand.hbm [shape: f32[2,32,128], index: 0, kind: input, shape index: {}]   ;;  %s1077_s1 = inlined_call_operand.hbm [shape: f32[2,128,256], index: 1, kind: input, shape index: {}]   ;;  %s1078_s2 = inlined_call_operand.hbm [shape: f32[2,32,256], index: 2, kind: output, shape index: {}]  }
   0x1   :  { %9 = vsyncpa [#allocation3 + $0x1], 0 }
   0x2   :  { %10 = vsyncpa [#allocation6], 0 }
   0x3   :  { %12 = vsyncpa [#allocation6 + $0x1], 0 }
   0x4   :  { %13 = vsyncpa [#allocation4], 0 }
   0x5   :  { %15 = vsyncpa [#allocation4 + $0x1], 0  ;;  %s806_s9 = smov 0   ;;  %s808_s10 = smov 0  }
   0x6   :  { %s810_s11 = smov 0   ;;  %s812_s12 = smov 0  }
   0x7   :  { %s814_s13 = smov 0   ;;  %s816_s14 = smov 0  }
   0x8 LB: > { %s489_s15 = sadd.s32 4294967295, %s779_s14   ;;  %s490_s16 = sadd.s32 4294967294, %s779_s14   ;;  %s779_s14 = sphi %s816_s14, %s21_s14   ;;  %s775_s13 = sphi %s814_s13, %s1096_s13   ;;  %s771_s12 = sphi %s812_s12, %s1095_s12   ;;  %s767_s11 = sphi %s810_s11, %s1094_s11   ;;  %s763_s10 = sphi %s808_s10, %s1093_s10   ;;  %s759_s9 = sphi %s806_s9, %s1092_s9  }
   0x9   : > { %s33_s17 = sadd.s32 1, %s775_s13  ;;  %s40_s18 = sadd.s32 1, %s767_s11 }
   0xa   : > { %p35_p0 = scmp.ge.s32.totalorder %s33_s17, 2  ;;  %p47_p1 = scmp.ne.s32.totalorder %s767_s11, %s763_s10 }
   0xb   : > { %p48_p2 = scmp.eq.s32.totalorder %s779_s14, 0  ;;  %p53_p3 = scmp.ne.s32.totalorder %s763_s10, %s759_s9 }
   0xc   : > { %s1098_s17 = smov (%p35_p0, %s33_s17), 0  ;;  %p54_p5 = scmp.eq.s32.totalorder %s489_s15, 0 }
   0xd   : > { %p847_p4 = por %p48_p2, %p47_p1  ;;  %s37_s20 = ssub.s32 %s775_s13, %s1098_s17 }
   0xe   : > { %p107_p6 = scmp.eq.s32.totalorder %s489_s15, 1  ;;  %p38_p7 = scmp.eq.s32.totalorder %s37_s20, 0 }
   0xf   : > { %p853_p8 = por %p54_p5, %p53_p3  ;;  %p113_p10 = scmp.eq.s32.totalorder %s490_s16, 1 }
  0x10   : > { %p857_p9 = por %p107_p6, %p47_p1  ;;  %p576_p13 = scmp.lt.s32.totalorder %s779_s14, 2 }
  0x11   : > { %s1082_s21 = scalar_select %p853_p8, 1, 0 }
  0x12   : > { %s1083_s22 = scalar_select %p857_p9, 1, 0 }
  0x13   : > { %s862_s23 = scalar_select %p38_p7, %s767_s11, %s40_s18  }
  0x14   : > { %p864_p11 = por %p113_p10, %p53_p3  ;;  %s871_s25 = sand.u32 1, %s767_s11  }
  0x15   : > { %s493_s26 = sshll.u32 %s871_s25, 5  ;;  %s508_s27 = sshll.u32 %s775_s13, 9 }
  0x16   : > { %s1084_s24 = scalar_select %p864_p11, 1, 0 }
  0x17   : > { %s878_s30 = scalar_lea.hbm %s1076_s0, %s508_s27  ;;  %s137_s3 = scalar_lea.vmem [#allocation2], %s493_s26 }
  0x18   : > { %s144_s4 = sshll.u32 %s137_s3, 4  ;;  %p884_p0 = pnand %p576_p13, %p847_p4  ;;  %s880_s4 = int_to_ptr.vmem [resolvable:$true] %s144_s4 }
  0x19   : > { %s134_s6 = scalar_lea.sflag [#allocation3], %s871_s25  ;;  %s633_s7 = scalar_lea.hbm %s878_s30, 512 }
  0x1a   : > { %p634_p2 = scmp.ne.s32.totalorder %s878_s30, %s633_s7  ;;  %p635_p3 = pneg %p884_p0 }
  0x1b   : > { %s638_s16 = scalar_lea.hbm %s1076_s0, 1024  ;;  %p639_p4 = scmp.lt.u32.totalorder %s878_s30, %s1076_s0 }
  0x1c   : > { %p636_p5 = pnand %p635_p3, %p634_p2  ;;  %p640_p7 = scmp.lt.u32.totalorder %s638_s16, %s633_s7 }
  0x1d   : > { %p642_p13 = scmp.lt.u32.totalorder %s633_s7, %s878_s30 }
  0x1e   : > { %p637_p6 = pneg %p636_p5  ;;  %p641_p10 = por %p640_p7, %p639_p4 }
  0x20   : > { %p643_p12 = por %p642_p13, %p641_p10 }
  0x22   : > { %p644_p1 = pnand %p643_p12, %p637_p6 }
  0x24   : > { %647 = shalt.err (!%p644_p1)
}
  0x25   : > { %s648_s20 = scalar_lea.vmem %s880_s4, 512  ;;  %s781_s26 = smov [#allocation2]  }
  0x26   : > { %p649_p2 = scmp.ne.s32.totalorder %s880_s4, %s648_s20  ;;  %s653_s27 = sshll.u32 %s781_s26, 4  ;;  %s654_s27 = int_to_ptr.vmem [resolvable:$false] %s653_s27 }
  0x27   : > { %s655_s28 = scalar_lea.vmem %s654_s27, 1024  ;;  %p656_p9 = scmp.lt.s32.totalorder %s880_s4, %s654_s27 }
  0x28   : > { %p651_p5 = pnand %p649_p2, %p635_p3  ;;  %p657_p4 = scmp.lt.s32.totalorder %s655_s28, %s648_s20 }
  0x2a   : > { %p652_p11 = pneg %p651_p5  ;;  %p658_p7 = por %p657_p4, %p656_p9 }
  0x2c   : > { %p659_p10 = pnand %p658_p7, %p652_p11 }
  0x2e   : > { %662 = shalt.err (!%p659_p10)
}
  0x2f   : > { %s782_s29 = smov 128   ;;  %s783_s3 = smov 8  }
  0x30   : > { %568 = dma.hbm_to_vmem [thread:$0]  (!%p884_p0), %s878_s30, 512, %s880_s4, %s134_s6, %s782_s29, %s782_s29, %s783_s3  }
  0x31   : > { %p175_p12 = scmp.lt.s32.totalorder %s779_s14, 3  ;;  %s496_s7 = sshll.u32 %s871_s25, 8 }
  0x32   : > { %s509_s8 = sshll.u32 %s775_s13, 12  ;;  %p1086_p9 = scmp.ge.s32.totalorder %s779_s14, 1 }
  0x33   : > { %s929_s19 = scalar_lea.hbm %s1077_s1, %s509_s8  ;;  %s158_s20 = scalar_lea.vmem [#allocation5], %s496_s7 }
  0x34   : > { %p922_p11 = pnand %p1086_p9, %p175_p12  ;;  %s167_s26 = sshll.u32 %s158_s20, 4  ;;  %s931_s26 = int_to_ptr.vmem [resolvable:$true] %s167_s26 }
  0x35   : > { %s155_s30 = scalar_lea.sflag [#allocation6], %s871_s25  ;;  %s663_s4 = scalar_lea.hbm %s929_s19, 4096 }
  0x36   : > { %p664_p1 = scmp.ne.s32.totalorder %s929_s19, %s663_s4  ;;  %s668_s28 = scalar_lea.hbm %s1077_s1, 8192 }
  0x37   : > { %p669_p2 = scmp.lt.u32.totalorder %s929_s19, %s1077_s1  ;;  %p670_p5 = scmp.lt.u32.totalorder %s668_s28, %s663_s4 }
  0x38   : > { %p666_p6 = pnand %p664_p1, %p635_p3  ;;  %p672_p7 = scmp.lt.u32.totalorder %s663_s4, %s929_s19 }
  0x39   : > { %p671_p4 = por %p670_p5, %p669_p2 }
  0x3a   : > { %p667_p13 = pneg %p666_p6 }
  0x3b   : > { %p673_p10 = por %p672_p7, %p671_p4 }
  0x3d   : > { %p674_p12 = pnand %p673_p10, %p667_p13 }
  0x3f   : > { %677 = shalt.err (!%p674_p12)
}
  0x40   : > { %s678_s7 = scalar_lea.vmem %s931_s26, 4096  ;;  %s784_s8 = smov [#allocation5]  }
  0x41   : > { %p679_p9 = scmp.ne.s32.totalorder %s931_s26, %s678_s7  ;;  %s683_s16 = sshll.u32 %s784_s8, 4  ;;  %s684_s16 = int_to_ptr.vmem [resolvable:$false] %s683_s16 }
  0x42   : > { %s685_s18 = scalar_lea.vmem %s684_s16, 8192  ;;  %p686_p8 = scmp.lt.s32.totalorder %s931_s26, %s684_s16 }
  0x43   : > { %p681_p1 = pnand %p679_p9, %p635_p3  ;;  %p687_p2 = scmp.lt.s32.totalorder %s685_s18, %s678_s7 }
  0x45   : > { %p682_p6 = pneg %p681_p1  ;;  %p688_p5 = por %p687_p2, %p686_p8 }
  0x47   : > { %p689_p4 = pnand %p688_p5, %p682_p6 }
  0x49   : > { %692 = shalt.err (!%p689_p4)
}
  0x4a   : > { %s785_s20 = smov 256   ;;  %s786_s4 = smov 16  }
  0x4b   : > { %571 = dma.hbm_to_vmem [thread:$0]  (!%p884_p0), %s929_s19, 4096, %s931_s26, %s155_s30, %s785_s20, %s785_s20, %s786_s4  }
  0x4c   : > { %179 = sbr.rel (%p922_p11) target bundleno = 356 (0x164), region = 28  ;;  %s962_s6 = sand.u32 (!%p922_p11), 1, %s763_s10  }
  0x4d   : > { %s500_s27 = sshll.u32 (!%p922_p11), %s962_s6, 5  ;;  %s182_s28 = scalar_lea.sflag (!%p922_p11), [#allocation3], %s962_s6 }
  0x4e   : > { %s966_s29 = scalar_lea.vmem (!%p922_p11), [#allocation2], %s500_s27  ;;  %p1088_p8 = scmp.ne.s32.totalorder (!%p922_p11), %s1082_s21, 0 }
  0x53   : > { %746 = dma.done.wait (%p1088_p8), %s182_s28, 512  }
  0x54   : > { %748 = vsyncadd (%p1088_p8), %s182_s28, 4294966784  ;;  %s501_s25 = sshll.u32 %s962_s6, 8  ;;  %s191_s5 = scalar_lea.sflag [#allocation6], %s962_s6 }
  0x55   : > { %s974_s15 = scalar_lea.vmem [#allocation5], %s501_s25 }
  0x56   : > { %750 = dma.done.wait (%p1088_p8), %s191_s5, 4096  }
  0x57   : > { %752 = vsyncadd (%p1088_p8), %s191_s5, 4294963200  ;;  %v787_v0 = vmov 0.0   ;;  %v223_v1 = vld [vmem:[%s974_s15 + $0x8] sm:$0xff]  ;;  %v225_v2 = vld [vmem:[%s974_s15 + $0x18] sm:$0xff]  ;;  %s502_s21 = sshll.u32 %s962_s6, 6  ;;  %s510_s30 = sshll.u32 %s771_s12, 10 }
  0x58   : > { %322 = vmatprep.mubr.f32.mxu0 %v787_v0  ;;  %334 = vmatprep.mubr.f32.mxu1 %v787_v0  ;;  %v222_v3 = vld [vmem:[%s974_s15] sm:$0xff]  ;;  %v511_v4 = vpack.c.bf16 %v225_v2, %v223_v1  ;;  %v224_v5 = vld [vmem:[%s974_s15 + $0x10] sm:$0xff]  ;;  %v227_v6 = vld [vmem:[%s974_s15 + $0x28] sm:$0xff]  ;;  %s219_s19 = scalar_lea.vmem [#allocation7], %s502_s21  ;;  %s1027_s12 = scalar_lea.hbm %s1078_s2, %s510_s30 }
  0x59   : > { %v229_v7 = vld [vmem:[%s974_s15 + $0x38] sm:$0xff]  ;;  %v513_v8 = vpack.c.bf16 %v224_v5, %v222_v3  ;;  %v226_v10 = vld [vmem:[%s974_s15 + $0x20] sm:$0xff]  ;;  %v228_v11 = vld [vmem:[%s974_s15 + $0x30] sm:$0xff]  ;;  %s379_s26 = sshll.u32 %s219_s19, 4  ;;  %s364_s8 = scalar_lea.sflag [#allocation4], %s962_s6  ;;  %s1022_s26 = int_to_ptr.vmem [resolvable:$true] %s379_s26 }
  0x5a   : > { %v515_v9 = vpack.c.bf16 %v229_v7, %v227_v6  ;;  %v231_v12 = vld [vmem:[%s974_s15 + $0x48] sm:$0xff]  ;;  %512 = vmatprep.subr.bf16.mxu0 %v511_v4  ;;  %543 = vmatprep.subr.bf16.mxu1 %v511_v4  ;;  %v233_v13 = vld [vmem:[%s974_s15 + $0x58] sm:$0xff]  ;;  %v517_v14 = vpack.c.bf16 %v228_v11, %v226_v10  ;;  %v230_v16 = vld [vmem:[%s974_s15 + $0x40] sm:$0xff]  ;;  %s693_s16 = scalar_lea.vmem %s1022_s26, 1024  ;;  %p1089_p3 = scmp.ne.s32.totalorder %s1083_s22, 0 }
  0x5b   : > { %514 = vmatpush1.bf16.msra.mxu0 %v513_v8  ;;  %551 = vmatpush1.bf16.msra.mxu1 %v513_v8  ;;  %v519_v15 = vpack.c.bf16 %v233_v13, %v231_v12  ;;  %v232_v17 = vld [vmem:[%s974_s15 + $0x50] sm:$0xff]  ;;  %v235_v18 = vld [vmem:[%s974_s15 + $0x68] sm:$0xff]  ;;  %v237_v19 = vld [vmem:[%s974_s15 + $0x78] sm:$0xff]  ;;  %p694_p0 = scmp.ne.s32.totalorder %s1022_s26, %s693_s16  ;;  %s788_s18 = smov [#allocation7]  }
  0x5c   : > { %516 = vmatprep.subr.bf16.mxu0 %v515_v9  ;;  %544 = vmatprep.subr.bf16.mxu1 %v515_v9  ;;  %v521_v20 = vpack.c.bf16 %v232_v17, %v230_v16  ;;  %v523_v21 = vpack.c.bf16 %v237_v19, %v235_v18  ;;  %v234_v22 = vld [vmem:[%s974_s15 + $0x60] sm:$0xff]  ;;  %v236_v23 = vld [vmem:[%s974_s15 + $0x70] sm:$0xff]  ;;  %v239_v24 = vld [vmem:[%s974_s15 + $0x88] sm:$0xff]  ;;  %s697_s20 = sshll.u32 %s788_s18, 4  ;;  %s698_s20 = int_to_ptr.vmem [resolvable:$false] %s697_s20 }
  0x5d   : > { %v241_v25 = vld [vmem:[%s974_s15 + $0x98] sm:$0xff]  ;;  %v525_v26 = vpack.c.bf16 %v236_v23, %v234_v22  ;;  %v238_v28 = vld [vmem:[%s974_s15 + $0x80] sm:$0xff]  ;;  %v240_v29 = vld [vmem:[%s974_s15 + $0x90] sm:$0xff]  ;;  %p695_p11 = pnand %p694_p0, %p1089_p3  ;;  %s699_s4 = scalar_lea.vmem %s698_s20, 2048 }
  0x5e   : > { %v527_v27 = vpack.c.bf16 %v241_v25, %v239_v24  ;;  %v243_v30 = vld [vmem:[%s974_s15 + $0xa8] sm:$0xff]  ;;  %v245_v31 = vld [vmem:[%s974_s15 + $0xb8] sm:$0xff]  ;;  %v529_v32 = vpack.c.bf16 %v240_v29, %v238_v28  ;;  %v242_v34 = vld [vmem:[%s974_s15 + $0xa0] sm:$0xff]  ;;  %p700_p7 = scmp.lt.s32.totalorder %s1022_s26, %s698_s20  ;;  %p701_p10 = scmp.lt.s32.totalorder %s699_s4, %s693_s16 }
  0x5f   : > { %518 = vmatpush1.bf16.msra.mxu0 %v517_v14  ;;  %552 = vmatpush1.bf16.msra.mxu1 %v517_v14  ;;  %v531_v33 = vpack.c.bf16 %v245_v31, %v243_v30  ;;  %v244_v35 = vld [vmem:[%s974_s15 + $0xb0] sm:$0xff]  ;;  %v247_v36 = vld [vmem:[%s974_s15 + $0xc8] sm:$0xff]  ;;  %v249_v37 = vld [vmem:[%s974_s15 + $0xd8] sm:$0xff]  ;;  %p696_p13 = pneg %p695_p11 }
  0x60   : > { %520 = vmatprep.subr.bf16.mxu0 %v519_v15  ;;  %545 = vmatprep.subr.bf16.mxu1 %v519_v15  ;;  %v533_v38 = vpack.c.bf16 %v244_v35, %v242_v34  ;;  %v535_v39 = vpack.c.bf16 %v249_v37, %v247_v36  ;;  %v246_v40 = vld [vmem:[%s974_s15 + $0xc0] sm:$0xff]  ;;  %v248_v41 = vld [vmem:[%s974_s15 + $0xd0] sm:$0xff]  ;;  %v251_v42 = vld [vmem:[%s974_s15 + $0xe8] sm:$0xff]  ;;  %p702_p12 = por %p701_p10, %p700_p7 }
  0x61   : > { %v253_v43 = vld [vmem:[%s974_s15 + $0xf8] sm:$0xff]  ;;  %v537_v44 = vpack.c.bf16 %v248_v41, %v246_v40  ;;  %v250_v46 = vld [vmem:[%s974_s15 + $0xe0] sm:$0xff]  ;;  %v252_v47 = vld [vmem:[%s974_s15 + $0xf0] sm:$0xff] }
  0x62   : > { %v539_v45 = vpack.c.bf16 %v253_v43, %v251_v42  ;;  %v541_v48 = vpack.c.bf16 %v252_v47, %v250_v46  ;;  %v254_v49 = vld [vmem:[%s966_s29] sm:$0xff]  ;;  %v256_v50 = vld [vmem:[%s966_s29 + $0x10] sm:$0xff]  ;;  %v255_v51 = vld [vmem:[%s966_s29 + $0x8] sm:$0xff]  ;;  %p703_p9 = pnand %p702_p12, %p696_p13 }
  0x63   : > { %522 = vmatpush1.bf16.msra.mxu0 %v521_v20  ;;  %553 = vmatpush1.bf16.msra.mxu1 %v521_v20  ;;  %v257_v52 = vld [vmem:[%s966_s29 + $0x18] sm:$0xff] }
  0x64   : > { %524 = vmatprep.subr.bf16.mxu0 %v523_v21  ;;  %546 = vmatprep.subr.bf16.mxu1 %v523_v21 }
  0x67   : > { %526 = vmatpush1.bf16.msra.mxu0 %v525_v26  ;;  %554 = vmatpush1.bf16.msra.mxu1 %v525_v26 }
  0x68   : > { %528 = vmatprep.subr.bf16.mxu0 %v527_v27  ;;  %547 = vmatprep.subr.bf16.mxu1 %v527_v27 }
  0x6b   : > { %530 = vmatpush1.bf16.msra.mxu0 %v529_v32  ;;  %555 = vmatpush1.bf16.msra.mxu1 %v529_v32 }
  0x6c   : > { %532 = vmatprep.subr.bf16.mxu0 %v531_v33  ;;  %548 = vmatprep.subr.bf16.mxu1 %v531_v33 }
  0x6f   : > { %534 = vmatpush1.bf16.msra.mxu0 %v533_v38  ;;  %556 = vmatpush1.bf16.msra.mxu1 %v533_v38 }
  0x70   : > { %536 = vmatprep.subr.bf16.mxu0 %v535_v39  ;;  %549 = vmatprep.subr.bf16.mxu1 %v535_v39 }
  0x73   : > { %538 = vmatpush1.bf16.msra.mxu0 %v537_v44  ;;  %557 = vmatpush1.bf16.msra.mxu1 %v537_v44 }
  0x74   : > { %540 = vmatprep.subr.bf16.mxu0 %v539_v45  ;;  %550 = vmatprep.subr.bf16.mxu1 %v539_v45 }
  0x77   : > { %542 = vmatpush1.bf16.msra.mxu0 %v541_v48  ;;  %558 = vmatpush1.bf16.msra.mxu1 %v541_v48 }
  0x7a   : > { %323 = vmatmul.mubr.f32.vlgmr.msra.gmra.mrb[0].mxu0 %v254_v49  ;;  %335 = vmatmul.mubr.f32.vlgmr.msra.gmra.mrb[0].mxu1 %v256_v50 }
  0x7b   : > { %328 = vmatprep.mubr.f32.mxu0 %v787_v0  ;;  %340 = vmatprep.mubr.f32.mxu1 %v787_v0 }
  0x7e   : > { %329 = vmatmul.mubr.f32.gmra.mrb[2].mxu0 %v255_v51  ;;  %341 = vmatmul.mubr.f32.gmra.mrb[2].mxu1 %v257_v52 }
 0x14d   : > { %v324_v53 = vpop.f32.mrb[0].mxu0  ;;  %v336_v54 = vpop.f32.mrb[0].mxu1 }
 0x14e   : > { %v347_v55 = vmax.f32 %v324_v53, 0.0  ;;  %v351_v56 = vmax.f32 %v336_v54, 0.0  ;;  %v326_v57 = vpop.f32.mrb[1].mxu0  ;;  %v338_v58 = vpop.f32.mrb[1].mxu1 }
 0x14f   : > { %v348_v59 = vmax.f32 %v326_v57, 0.0  ;;  %v352_v60 = vmax.f32 %v338_v58, 0.0 }
 0x150   : > { %355 = vst [vmem:[%s219_s19] sm:$0xff] %v347_v55  ;;  %359 = vst [vmem:[%s219_s19 + $0x20] sm:$0xff] %v351_v56 }
 0x151   : > { %356 = vst [vmem:[%s219_s19 + $0x8] sm:$0xff] %v348_v59  ;;  %360 = vst [vmem:[%s219_s19 + $0x28] sm:$0xff] %v352_v60  ;;  %v330_v61 = vpop.f32.mrb[2].mxu0  ;;  %v342_v62 = vpop.f32.mrb[2].mxu1 }
 0x152   : > { %v349_v63 = vmax.f32 %v330_v61, 0.0  ;;  %v353_v0 = vmax.f32 %v342_v62, 0.0  ;;  %v332_v1 = vpop.f32.mrb[3].mxu0  ;;  %v344_v2 = vpop.f32.mrb[3].mxu1 }
 0x153   : > { %v350_v3 = vmax.f32 %v332_v1, 0.0  ;;  %v354_v4 = vmax.f32 %v344_v2, 0.0 }
 0x154   : > { %357 = vst [vmem:[%s219_s19 + $0x10] sm:$0xff] %v349_v63  ;;  %361 = vst [vmem:[%s219_s19 + $0x30] sm:$0xff] %v353_v0 }
 0x155   : > { %358 = vst [vmem:[%s219_s19 + $0x18] sm:$0xff] %v350_v3  ;;  %362 = vst [vmem:[%s219_s19 + $0x38] sm:$0xff] %v354_v4 }
 0x156   : > { %706 = shalt.err (!%p703_p9)
}
 0x157   : > { %s707_s27 = scalar_lea.hbm %s1027_s12, 1024  ;;  %s711_s25 = scalar_lea.hbm %s1078_s2, 2048 }
 0x158   : > { %p708_p1 = scmp.ne.s32.totalorder %s1027_s12, %s707_s27  ;;  %p712_p5 = scmp.lt.u32.totalorder %s1027_s12, %s1078_s2 }
 0x159   : > { %p713_p4 = scmp.lt.u32.totalorder %s711_s25, %s707_s27  ;;  %p715_p0 = scmp.lt.u32.totalorder %s707_s27, %s1027_s12 }
 0x15a   : > { %p709_p6 = pnand %p708_p1, %p1089_p3 }
 0x15b   : > { %p714_p8 = por %p713_p4, %p712_p5 }
 0x15c   : > { %p710_p2 = pneg %p709_p6 }
 0x15d   : > { %p716_p11 = por %p715_p0, %p714_p8 }
 0x15f   : > { %p717_p13 = pnand %p716_p11, %p710_p2 }
 0x161   : > { %720 = shalt.err (!%p717_p13)
}
 0x162   : > { %s789_s21 = smov 256   ;;  %s790_s19 = smov 16  }
 0x163   : > { %563 = dma.vmem_to_hbm [thread:$0]  (%p1089_p3), %s1022_s26, 1024, %s1027_s12, %s364_s8, %s789_s21, %s789_s21, %s790_s19  }
 0x164 PF: > { %s394_s30 = sand.u32 1, %s759_s9   ;;  %p1090_p7 = scmp.ne.s32.totalorder %s1084_s24, 0 }
 0x165   : > { %p1091_p10 = scmp.ge.s32.totalorder %s779_s14, 2  ;;  %s395_s3 = scalar_lea.sflag [#allocation4], %s394_s30 }
 0x167   : > { %p573_p12 = pnand %p1091_p10, %p1090_p7 }
 0x169   : > { %754 = dma.done.wait (!%p573_p12), %s395_s3, 1024  }
 0x16a   : > { %756 = vsyncadd (!%p573_p12), %s395_s3, 4294966272  ;;  %s21_s14 = sadd.s32 1, %s779_s14   ;;  %s1092_s9 = smov %s763_s10 }
 0x16b   : > { %p18_p9 = scmp.ge.s32.totalorder %s21_s14, 4   ;;  %s1093_s10 = smov %s767_s11 }
 0x16c   : > { %s1094_s11 = smov %s862_s23  ;;  %s1095_s12 = smov %s775_s13 }
 0x16d   : > { %s1096_s13 = smov %s1098_s17  ;;  %20 = sbr.rel (!%p18_p9) target bundleno = 8 (0x8), region = 86 }
 0x174   :  { %400 = vsyncpa [#allocation3], 1 }
 0x175   :  { %402 = vsyncpa [#allocation3 + $0x1], 1 }
 0x176   :  { %403 = vsyncpa [#allocation6], 1 }
 0x177   :  { %405 = vsyncpa [#allocation6 + $0x1], 1 }
 0x178   :  { %406 = vsyncpa [#allocation4], 1 }
 0x179   :  { %408 = vsyncpa [#allocation4 + $0x1], 1 }

</bundles_post_ra>
